<compile_context>
chip_gen: v7x
topology: tpu7x:2x2x1
jax: 0.10.0
libtpu: 0.0.40
codegen_flags: <defaults>
</compile_context>

<pallas_src>
import functools

import jax
import jax.numpy as jnp
from jax.experimental import pallas as pl
from jax.experimental.pallas import tpu as pltpu

EPS = 1e-5
LANE = 128


# ----------------------------- tiling helpers ------------------------------ #
def _sublane(dtype):
    # f32 -> 8, bf16/f16 -> 16, int8/fp8 -> 32
    return max(8, 32 // jnp.dtype(dtype).itemsize)


_VMEM_CAP = None


def _vmem_cap_bytes():
    # Generation-aware: ~half of physical VMEM, capped at 48 MiB
    # (v7x: 64 MiB/TC -> 32 MiB; v5e/v6e: 128 MiB -> 48 MiB).
    try:
        cap = int(pltpu.get_tpu_info().vmem_capacity_bytes)
    except Exception:  # noqa: BLE001 - be robust if the query is unavailable
        cap = 128 << 20
    return int(min(max(cap // 2, 16 << 20), 48 << 20))


def _cparams(sem, block_bytes):
    global _VMEM_CAP
    if _VMEM_CAP is None:
        _VMEM_CAP = _vmem_cap_bytes()
    # 4x covers double-buffered in+out; +4 MiB for in-kernel f32 temporaries.
    limit = int(min(max(4 * block_bytes + (4 << 20), 16 << 20), _VMEM_CAP))
    return pltpu.CompilerParams(dimension_semantics=sem, vmem_limit_bytes=limit)


def _row_tile(n_rows, width, dtype, bytes_per_elem, budget):
    """Row tile (multiple of the sublane count) such that
    width * tile * bytes_per_elem <= budget; prefer a tile dividing n_rows so
    no masked partial blocks are generated."""
    sub = _sublane(dtype)
    per_row = max(width * bytes_per_elem, 1)
    tm = (budget // per_row) // sub * sub
    tm = max(sub, tm)
    if tm >= n_rows:
        return n_rows  # single full block (equal to full dim -> always legal)
    t = tm
    while t >= max(sub, tm // 2):
        if n_rows % t == 0:
            return t
        t -= sub
    return tm  # partial last block; garbage rows masked / discarded


def _fused_col_tile(G, R, H, per_elem, budget):
    """Column tile for the fused channel kernel, or None if no (1, R, th)
    block fits `budget`."""
    if H <= LANE:
        th = H
        if R * th * per_elem > budget:
            return None
    else:
        th = (budget // max(R * per_elem, 1)) // LANE * LANE
        if th < LANE:
            return None
        if th >= H:
            th = H
        else:
            t = th  # prefer a divisor of H (no padded column tiles)
            while t >= max(LANE, th // 2):
                if H % t == 0:
                    th = t
                    break
                t -= LANE
    # v7x has 2 TensorCores: give the grid enough steps to shard + pipeline.
    nh = pl.cdiv(H, th)
    while G * nh < 8 and th > LANE and (th // 2) % LANE == 0:
        th //= 2
        nh = pl.cdiv(H, th)
    return th


# ----------------------------- row-wise kernels (layer / rms) -------------- #
def _layernorm_kernel(x_ref, w_ref, b_ref, o_ref, *, eps):
    x = x_ref[...].astype(jnp.float32)                       # (TM, H)
    mean = jnp.mean(x, axis=-1, keepdims=True)
    xc = x - mean
    var = jnp.mean(xc * xc, axis=-1, keepdims=True)          # biased (torch)
    w = w_ref[...].astype(jnp.float32)
    b = b_ref[...].astype(jnp.float32)
    o_ref[...] = (xc * jax.lax.rsqrt(var + eps) * w + b).astype(o_ref.dtype)


def _rmsnorm_kernel(x_ref, w_ref, o_ref, *, eps):
    x = x_ref[...].astype(jnp.float32)                       # (TM, H), x.float()
    ms = jnp.mean(x * x, axis=-1, keepdims=True)
    w = w_ref[...].astype(jnp.float32)
    o_ref[...] = (x * jax.lax.rsqrt(ms + eps) * w).astype(o_ref.dtype)


def _segment_matrix(p, h):
    # Block-diagonal (p, p) matrix of ones over h-wide segments: x @ seg gives
    # per-segment sums, already broadcast across each segment's lanes.
    ii = jax.lax.broadcasted_iota(jnp.int32, (p, p), 0) // h
    jj = jax.lax.broadcasted_iota(jnp.int32, (p, p), 1) // h
    return (ii == jj).astype(jnp.float32)


def _layernorm_packed_kernel(x_ref, w_ref, b_ref, o_ref, *, eps, h):
    # k = P // h logical rows packed per 128-lane row -> lane-dense stores.
    x = x_ref[...].astype(jnp.float32)                       # (TM, P)
    p = x.shape[-1]
    seg = _segment_matrix(p, h)
    inv_h = jnp.float32(1.0 / h)
    mean = jnp.dot(x, seg, preferred_element_type=jnp.float32) * inv_h
    xc = x - mean
    var = jnp.dot(xc * xc, seg, preferred_element_type=jnp.float32) * inv_h
    w = w_ref[...].astype(jnp.float32)
    b = b_ref[...].astype(jnp.float32)
    o_ref[...] = (xc * jax.lax.rsqrt(var + eps) * w + b).astype(o_ref.dtype)


def _rmsnorm_packed_kernel(x_ref, w_ref, o_ref, *, eps, h):
    x = x_ref[...].astype(jnp.float32)                       # (TM, P)
    p = x.shape[-1]
    seg = _segment_matrix(p, h)
    ms = jnp.dot(x * x, seg, preferred_element_type=jnp.float32) * jnp.float32(1.0 / h)
    w = w_ref[...].astype(jnp.float32)
    o_ref[...] = (x * jax.lax.rsqrt(ms + eps) * w).astype(o_ref.dtype)


# ----------------------------- channel kernels (batch / instance) ---------- #
def _channel_fused_kernel(x_ref, w_ref, b_ref, o_ref, *, eps):
    x = x_ref[...].astype(jnp.float32)                       # (1, R, th)
    mean = jnp.mean(x, axis=1, keepdims=True)
    xc = x - mean
    var = jnp.mean(xc * xc, axis=1, keepdims=True)           # biased (torch)
    w = w_ref[...].astype(jnp.float32)                       # (1, 1, th)
    b = b_ref[...].astype(jnp.float32)
    o_ref[...] = (xc * jax.lax.rsqrt(var + eps) * w + b).astype(o_ref.dtype)


def _channel_stats_kernel(x_ref, w_ref, b_ref, s_ref, acc_ref, *,
                          eps, n_rows, n_cols, tr, need_row_mask, need_col_mask):
    # grid = (G [parallel], H-tiles [parallel], row-tiles [arbitrary reduction])
    i = pl.program_id(2)

    @pl.when(i == 0)
    def _init():
        acc_ref[...] = jnp.zeros_like(acc_ref)

    x = x_ref[0].astype(jnp.float32)                         # (tr, th)
    if need_row_mask:
        row = i * tr + jax.lax.broadcasted_iota(jnp.int32, x.shape, 0)
        x = jnp.where(row < n_rows, x, 0.0)
    if need_col_mask:
        j = pl.program_id(1)
        col = j * x.shape[-1] + jax.lax.broadcasted_iota(jnp.int32, x.shape, 1)
        x = jnp.where(col < n_cols, x, 0.0)

    th = x.shape[-1]
    if tr % 8 == 0:
        # Pure VPU slab accumulation; the 8->1 cross-sublane (XLU) reduce
        # happens once in the finalize, not per streaming step.
        xs = x.reshape(tr // 8, 8, th)
        acc_ref[0:8, :] += jnp.sum(xs, axis=0)
        acc_ref[8:16, :] += jnp.sum(xs * xs, axis=0)
    else:
        acc_ref[0:1, :] += jnp.sum(x, axis=0, keepdims=True)
        acc_ref[8:9, :] += jnp.sum(x * x, axis=0, keepdims=True)

    @pl.when(i == pl.num_programs(2) - 1)
    def _finalize():
        ssum = jnp.sum(acc_ref[0:8, :], axis=0, keepdims=True)    # (1, th)
        ssq = jnp.sum(acc_ref[8:16, :], axis=0, keepdims=True)
        inv_n = jnp.float32(1.0 / n_rows)
        mean = ssum * inv_n
        var = jnp.maximum(ssq * inv_n - mean * mean, 0.0)
        inv_std = jax.lax.rsqrt(var + eps)
        w = w_ref[...].astype(jnp.float32)                        # (1, th)
        b = b_ref[...].astype(jnp.float32)
        scale = inv_std * w
        shift = b - mean * scale
        s_ref[...] = jnp.concatenate([scale, shift], axis=0)[None]  # (1, 2, th)


def _channel_apply_kernel(x_ref, s_ref, o_ref):
    x = x_ref[...].astype(jnp.float32)                       # (1, tr, th)
    s = s_ref[0]                                             # (2, th)
    scale = s[0:1, :][None]                                  # (1, 1, th)
    shift = s[1:2, :][None]
    o_ref[...] = (x * scale + shift).astype(o_ref.dtype)


# ----------------------------- channel wrappers ----------------------------- #
def _channel_norm_fused(x3, w, b, eps, th):
    G, R, H = x3.shape
    isz = jnp.dtype(x3.dtype).itemsize
    nh = pl.cdiv(H, th)
    w3 = w.reshape(1, 1, H)
    b3 = b.reshape(1, 1, H)
    return pl.pallas_call(
        functools.partial(_channel_fused_kernel, eps=eps),
        out_shape=jax.ShapeDtypeStruct((G, R, H), x3.dtype),
        grid=(G, nh),
        in_specs=[
            pl.BlockSpec((1, R, th), lambda g, j: (g, 0, j)),
            pl.BlockSpec((1, 1, th), lambda g, j: (0, 0, j)),
            pl.BlockSpec((1, 1, th), lambda g, j: (0, 0, j)),
        ],
        out_specs=pl.BlockSpec((1, R, th), lambda g, j: (g, 0, j)),
        compiler_params=_cparams(("parallel", "parallel"), 2 * R * th * isz),
    )(x3, w3, b3)


def _channel_norm_tiled(x3, w, b, eps, tile_budget):
    G, R, H = x3.shape
    dtype = x3.dtype
    isz = jnp.dtype(dtype).itemsize
    temp = 0 if isz == 4 else 4                    # f32 compute temp for narrow dtypes
    th = H if H <= 2048 else 2048
    nh = pl.cdiv(H, th)
    w2 = w.reshape(1, H)
    b2 = b.reshape(1, H)

    # --- pass 1: per-(g, channel) scale/shift.  Input-only stream -> fatter tiles.
    tr_s = _row_tile(R, th, dtype, isz + temp, tile_budget)
    nt_s = pl.cdiv(R, tr_s)
    stats = pl.pallas_call(
        functools.partial(
            _channel_stats_kernel, eps=eps, n_rows=R, n_cols=H, tr=tr_s,
            need_row_mask=(R % tr_s != 0), need_col_mask=(H % th != 0)),
        out_shape=jax.ShapeDtypeStruct((G, 2, H), jnp.float32),
        grid=(G, nh, nt_s),
        in_specs=[
            pl.BlockSpec((1, tr_s, th), lambda g, j, i: (g, i, j)),
            pl.BlockSpec((1, th), lambda g, j, i: (0, j)),
            pl.BlockSpec((1, th), lambda g, j, i: (0, j)),
        ],
        out_specs=pl.BlockSpec((1, 2, th), lambda g, j, i: (g, 0, j)),
        scratch_shapes=[pltpu.VMEM((16, th), jnp.float32)],
        compiler_params=_cparams(("parallel", "parallel", "arbitrary"),
                                 tr_s * th * isz),
    )(x3, w2, b2)

    # --- pass 2: y = x * scale + shift  (pure 2-operand stream).
    tr_a = _row_tile(R, th, dtype, 2 * isz + temp, tile_budget)
    nt_a = pl.cdiv(R, tr_a)
    return pl.pallas_call(
        _channel_apply_kernel,
        out_shape=jax.ShapeDtypeStruct((G, R, H), dtype),
        grid=(G, nh, nt_a),
        in_specs=[
            pl.BlockSpec((1, tr_a, th), lambda g, j, i: (g, i, j)),
            pl.BlockSpec((1, 2, th), lambda g, j, i: (g, 0, j)),
        ],
        out_specs=pl.BlockSpec((1, tr_a, th), lambda g, j, i: (g, i, j)),
        compiler_params=_cparams(("parallel", "parallel", "parallel"),
                                 2 * tr_a * th * isz),
    )(x3, stats)


# ----------------------------- public API ---------------------------------- #
def init_norm_params(normalization, hidden_dim, dtype=jnp.float32):
    """Deterministic init matching the PyTorch module (ones / zeros)."""
    if normalization == "rms":
        return {"weight": jnp.ones((hidden_dim,), dtype)}
    elif normalization in ("layer", "batch", "instance"):
        return {
            "weight": jnp.ones((hidden_dim,), dtype),
            "bias": jnp.zeros((hidden_dim,), dtype),
        }
    raise NotImplementedError(normalization)


def norm_forward(x, params, normalization, eps=EPS,
                 fused_budget_bytes=None, tile_budget_bytes=None):
    B, S, H = x.shape
    dtype = x.dtype
    isz = jnp.dtype(dtype).itemsize
    temp = 0 if isz == 4 else 4
    fused_budget = fused_budget_bytes or (8 << 20)
    tile_budget = tile_budget_bytes or (8 << 20)

    if normalization in ("layer", "rms"):
        # Row-wise over H: flatten to (B*S, H) and tile over rows.
        N = B * S
        k = 1
        if H < LANE and LANE % H == 0 and N % (LANE // H) == 0 \
                and (N // (LANE // H)) % 8 == 0:
            k = LANE // H          # pack k rows per 128-lane vreg (lane-dense)
        # TODO(synk): H < 128 with 128 % H != 0 stays lane-sparse (masked stores).
        P = k * H
        xf = x.reshape(N // k, P)
        bpe = 2 * isz + (8 if k > 1 else temp)     # packed path: mean/var temps
        tm = _row_tile(N // k, P, dtype, bpe, tile_budget)
        nt = pl.cdiv(N // k, tm)
        blk = 2 * tm * P * isz
        w = params["weight"].reshape(1, H)
        if k > 1:
            w = jnp.tile(w, (1, k))
        if normalization == "layer":
            b = params["bias"].reshape(1, H)
            if k > 1:
                b = jnp.tile(b, (1, k))
            kern = (functools.partial(_layernorm_packed_kernel, eps=eps, h=H)
                    if k > 1 else functools.partial(_layernorm_kernel, eps=eps))
            yf = pl.pallas_call(
                kern,
                out_shape=jax.ShapeDtypeStruct((N // k, P), dtype),
                grid=(nt,),
                in_specs=[
                    pl.BlockSpec((tm, P), lambda i: (i, 0)),
                    pl.BlockSpec((1, P), lambda i: (0, 0)),
                    pl.BlockSpec((1, P), lambda i: (0, 0)),
                ],
                out_specs=pl.BlockSpec((tm, P), lambda i: (i, 0)),
                compiler_params=_cparams(("parallel",), blk),
            )(xf, w, b)
        else:
            kern = (functools.partial(_rmsnorm_packed_kernel, eps=eps, h=H)
                    if k > 1 else functools.partial(_rmsnorm_kernel, eps=eps))
            yf = pl.pallas_call(
                kern,
                out_shape=jax.ShapeDtypeStruct((N // k, P), dtype),
                grid=(nt,),
                in_specs=[
                    pl.BlockSpec((tm, P), lambda i: (i, 0)),
                    pl.BlockSpec((1, P), lambda i: (0, 0)),
                ],
                out_specs=pl.BlockSpec((tm, P), lambda i: (i, 0)),
                compiler_params=_cparams(("parallel",), blk),
            )(xf, w)
        return yf.reshape(B, S, H)

    if normalization in ("batch", "instance"):
        # Both use batch statistics (track_running_stats=False).
        # batch:    stats over all B*S rows per channel h   -> G=1,  R=B*S
        # instance: stats over S per (b, h)                  -> G=B,  R=S
        x3 = x.reshape(1, B * S, H) if normalization == "batch" else x
        G, R, _ = x3.shape
        th = _fused_col_tile(G, R, H, 2 * isz + temp, fused_budget)
        if th is not None:
            y3 = _channel_norm_fused(x3, params["weight"], params["bias"], eps, th)
        else:
            y3 = _channel_norm_tiled(x3, params["weight"], params["bias"], eps,
                                     tile_budget)
        return y3.reshape(B, S, H)

    raise NotImplementedError(normalization)


# ----------------------------- reference (plain JAX) ----------------------- #
def _ref_norm(x, params, normalization, eps=EPS):
    xf = x.astype(jnp.float32)
    if normalization == "layer":
        mean = jnp.mean(xf, -1, keepdims=True)
        var = jnp.mean((xf - mean) ** 2, -1, keepdims=True)
        y = (xf - mean) * jax.lax.rsqrt(var + eps)
        y = y * params["weight"] + params["bias"]
    elif normalization == "rms":
        y = xf * jax.lax.rsqrt(jnp.mean(xf * xf, -1, keepdims=True) + eps)
        y = y * params["weight"]
    elif normalization == "batch":
        mean = jnp.mean(xf, axis=(0, 1), keepdims=True)
        var = jnp.mean((xf - mean) ** 2, axis=(0, 1), keepdims=True)
        y = (xf - mean) * jax.lax.rsqrt(var + eps)
        y = y * params["weight"] + params["bias"]
    elif normalization == "instance":
        mean = jnp.mean(xf, axis=1, keepdims=True)
        var = jnp.mean((xf - mean) ** 2, axis=1, keepdims=True)
        y = (xf - mean) * jax.lax.rsqrt(var + eps)
        y = y * params["weight"] + params["bias"]
    else:
        raise NotImplementedError(normalization)
    return y.astype(x.dtype)


# ----------------------------- main ---------------------------------------- #
if __name__ == "__main__":
    key = jax.random.PRNGKey(0)
    # (2,8,32): tiny module-default shape (lane-sparse H path).
    # (2,64,32): exercises the packed small-H (segment-matmul) path.
    # (4,520,256): exercises multi-tile rows + the fused channel path.
    shapes = [(2, 8, 32), (2, 64, 32), (4, 520, 256)]
    for (B, S, H) in shapes:
        key, sub = jax.random.split(key)
        x = jax.random.normal(sub, (B, S, H), dtype=jnp.float32)
        for mode in ("layer", "rms", "batch", "instance"):
            params = init_norm_params(mode, H)
            y = norm_forward(x, params, mode)
            jax.block_until_ready(y)
            y_ref = _ref_norm(x, params, mode)
            assert y.shape == x.shape and y.dtype == x.dtype
            err = float(jnp.max(jnp.abs(y.astype(jnp.float32)
                                        - y_ref.astype(jnp.float32))))
            assert err < 1e-4, f"mismatch in {mode} at {(B, S, H)}: {err}"

    # Exercise the tiled two-pass (grid-reduction) batch/instance path by
    # forcing small budgets, so it is validated even at demo sizes.
    xt = jax.random.normal(jax.random.PRNGKey(1), (4, 520, 256), dtype=jnp.float32)
    for mode in ("batch", "instance"):
        params = init_norm_params(mode, 256)
        y = norm_forward(xt, params, mode,
                         fused_budget_bytes=1 << 14,
                         tile_budget_bytes=200 * 1024)
        jax.block_until_ready(y)
        y_ref = _ref_norm(xt, params, mode)
        err = float(jnp.max(jnp.abs(y - y_ref)))
        assert err < 1e-4, f"mismatch in tiled {mode}: {err}"

    print("KERNEL_OK")
</pallas_src>

<mosaic_0001>
module attributes {stable_mosaic.version = 11 : i64} {
  func.func @_layernorm_kernel(%arg0: i32, %arg1: memref<16x32xf32, #tpu.memory_space<vmem>>, %arg2: memref<1x32xf32, #tpu.memory_space<vmem>>, %arg3: memref<1x32xf32, #tpu.memory_space<vmem>>, %arg4: memref<16x32xf32, #tpu.memory_space<vmem>>) attributes {dimension_semantics = [#tpu.dimension_semantics<parallel>], iteration_bounds = array<i64: 1>, scalar_prefetch = 0 : i64, scratch_operands = 0 : i64, tpu.core_type = #tpu.core_type<tc>, window_params = [{transform_indices = @transform_0, window_bounds = array<i64: 16, 32>}, {pipeline_mode = #tpu.pipeline_mode<synchronous>, transform_indices = @transform_1, window_bounds = array<i64: 1, 32>}, {pipeline_mode = #tpu.pipeline_mode<synchronous>, transform_indices = @transform_2, window_bounds = array<i64: 1, 32>}, {transform_indices = @transform_3, window_bounds = array<i64: 16, 32>}]} {
    %c0 = arith.constant 0 : index
    %c0_0 = arith.constant 0 : index
    %0 = vector.load %arg1[%c0, %c0_0] : memref<16x32xf32, #tpu.memory_space<vmem>>, vector<16x32xf32>
    %cst = arith.constant dense<0.000000e+00> : vector<16xf32>
    %1 = vector.multi_reduction <add>, %0, %cst [1] : vector<16x32xf32> to vector<16xf32>
    %2 = vector.shape_cast %1 : vector<16xf32> to vector<16x1xf32>
    %cst_1 = arith.constant 3.200000e+01 : f32
    %3 = vector.broadcast %cst_1 : f32 to vector<16x1xf32>
    %4 = arith.divf %2, %3 : vector<16x1xf32>
    %5 = vector.broadcast %4 : vector<16x1xf32> to vector<16x32xf32>
    %6 = arith.subf %0, %5 : vector<16x32xf32>
    %7 = arith.mulf %6, %6 : vector<16x32xf32>
    %cst_2 = arith.constant dense<0.000000e+00> : vector<16xf32>
    %8 = vector.multi_reduction <add>, %7, %cst_2 [1] : vector<16x32xf32> to vector<16xf32>
    %9 = vector.shape_cast %8 : vector<16xf32> to vector<16x1xf32>
    %cst_3 = arith.constant 3.200000e+01 : f32
    %10 = vector.broadcast %cst_3 : f32 to vector<16x1xf32>
    %11 = arith.divf %9, %10 : vector<16x1xf32>
    %c0_4 = arith.constant 0 : index
    %c0_5 = arith.constant 0 : index
    %12 = vector.load %arg2[%c0_4, %c0_5] : memref<1x32xf32, #tpu.memory_space<vmem>>, vector<1x32xf32>
    %c0_6 = arith.constant 0 : index
    %c0_7 = arith.constant 0 : index
    %13 = vector.load %arg3[%c0_6, %c0_7] : memref<1x32xf32, #tpu.memory_space<vmem>>, vector<1x32xf32>
    %cst_8 = arith.constant 9.99999974E-6 : f32
    %14 = vector.broadcast %cst_8 : f32 to vector<16x1xf32>
    %15 = arith.addf %11, %14 : vector<16x1xf32>
    %16 = math.rsqrt %15 : vector<16x1xf32>
    %17 = vector.broadcast %16 : vector<16x1xf32> to vector<16x32xf32>
    %18 = arith.mulf %6, %17 : vector<16x32xf32>
    %19 = vector.broadcast %12 : vector<1x32xf32> to vector<16x32xf32>
    %20 = arith.mulf %18, %19 : vector<16x32xf32>
    %21 = vector.broadcast %13 : vector<1x32xf32> to vector<16x32xf32>
    %22 = arith.addf %20, %21 : vector<16x32xf32>
    %c0_9 = arith.constant 0 : index
    %c0_10 = arith.constant 0 : index
    %23 = vector.load %arg4[%c0_9, %c0_10] : memref<16x32xf32, #tpu.memory_space<vmem>>, vector<16x32xf32>
    tpu.vector_store %arg4[%c0_9, %c0_10], %22 {strides = array<i32>} : memref<16x32xf32, #tpu.memory_space<vmem>>, vector<16x32xf32>,
    return
  }
  func.func @transform_0(%arg0: i32) -> (i32, i32) {
    %c0_i32 = arith.constant 0 : i32
    %c0_i32_0 = arith.constant 0 : i32
    return %arg0, %c0_i32 : i32, i32
  }
  func.func @transform_1(%arg0: i32) -> (i32, i32) {
    %c0_i32 = arith.constant 0 : i32
    %c0_i32_0 = arith.constant 0 : i32
    %c0_i32_1 = arith.constant 0 : i32
    return %c0_i32, %c0_i32_0 : i32, i32
  }
  func.func @transform_2(%arg0: i32) -> (i32, i32) {
    %c0_i32 = arith.constant 0 : i32
    %c0_i32_0 = arith.constant 0 : i32
    %c0_i32_1 = arith.constant 0 : i32
    return %c0_i32, %c0_i32_0 : i32, i32
  }
  func.func @transform_3(%arg0: i32) -> (i32, i32) {
    %c0_i32 = arith.constant 0 : i32
    %c0_i32_0 = arith.constant 0 : i32
    return %arg0, %c0_i32 : i32, i32
  }
}

</mosaic_0001>

<bundles_post_ra>
// kernel: tpu_custom_call.1
= control target key start
LH: loop header
LB: loop body
LE: loop exit
PB: predicated region body
PF: predicated region fallthrough
CT: control target
= control target key end

     0   :  { %8 = vsyncpa [#allocation3], 0  ;;  %s220_s0 = inlined_call_operand.hbm [shape: f32[16,32], index: 0, kind: input, shape index: {}]   ;;  %s221_s1 = inlined_call_operand.vmem [shape: f32[1,32], index: 1, kind: input, shape index: {}]   ;;  %s222_s2 = inlined_call_operand.vmem [shape: f32[1,32], index: 2, kind: input, shape index: {}]   ;;  %s223_s3 = inlined_call_operand.hbm [shape: f32[16,32], index: 3, kind: output, shape index: {}]  }
   0x1   :  { %9 = vsyncpa [#allocation4], 0  ;;  %s154_s12 = smov [#allocation2]   ;;  %s106_s16 = scalar_lea.hbm %s220_s0, 256 }
   0x2   :  { %s15_s13 = sshll.u32 %s154_s12, 4  ;;  %p107_p0 = scmp.ne.s32.totalorder %s220_s0, %s106_s16  ;;  %s16_s13 = int_to_ptr.vmem [resolvable:$true] %s15_s13 }
   0x3   :  { %p110_p1 = scmp.lt.u32.totalorder %s106_s16, %s220_s0 }
   0x5   :  { %p112_p2 = pnand %p110_p1, %p107_p0 }
   0x7   :  { %115 = shalt.err (!%p112_p2)
}
   0x8   :  { %s116_s21 = scalar_lea.vmem %s16_s13, 256  ;;  %p121_p4 = scmp.lt.s32.totalorder %s16_s13, %s16_s13 }
   0x9   :  { %p117_p3 = scmp.ne.s32.totalorder %s16_s13, %s116_s21  ;;  %p122_p5 = scmp.lt.s32.totalorder %s116_s21, %s116_s21 }
   0xb   :  { %p123_p6 = por %p122_p5, %p121_p4 }
   0xd   :  { %p124_p7 = pnand %p123_p6, %p117_p3 }
   0xf   :  { %127 = shalt.err (!%p124_p7)
}
  0x10   :  { %s155_s22 = smov 128   ;;  %s156_s23 = smov 8  }
  0x11   :  { %21 = dma.hbm_to_vmem [thread:$0]  %s220_s0, 256, %s16_s13, [#allocation3], %s155_s22, %s155_s22, %s156_s23  }
  0x12   :  { %150 = dma.done.wait [#allocation3], 256  }
  0x13   :  { %151 = vsyncadd [#allocation3], 4294967040  ;;  %vm31_vm0 = vcmask 261120   ;;  %v29_v0 = vld [vmem:[#allocation2] sm:$0xff]  ;;  %v30_v1 = vld [vmem:[#allocation2 + $0x8] sm:$0xff]  ;;  %s157_s29 = smov [#allocation5]  }
  0x14   :  { %v32_v2 = vsel %vm31_vm0, %v29_v0, 0.0  ;;  %v35_v3 = vsel %vm31_vm0, %v30_v1, 0.0  ;;  %v96_v21 = vld [vmem:[%s221_s1] ss:$0 sm:$0xff]  ;;  %s84_s30 = sshll.u32 %s157_s29, 4  ;;  %s85_s30 = int_to_ptr.vmem [resolvable:$true] %s84_s30 }
  0x15   :  { %33 = vadd.xlane.f32.xlu0 %v32_v2  ;;  %v97_v23 = vld [vmem:[%s222_s2] ss:$0 sm:$0xff]  ;;  %s128_s4 = scalar_lea.vmem %s85_s30, 256  ;;  %p133_p9 = scmp.lt.s32.totalorder %s85_s30, %s85_s30 }
  0x16   :  { %p129_p8 = scmp.ne.s32.totalorder %s85_s30, %s128_s4  ;;  %p134_p10 = scmp.lt.s32.totalorder %s128_s4, %s128_s4 }
  0x18   :  { %p135_p11 = por %p134_p10, %p133_p9 }
  0x19   :  { %36 = vadd.xlane.f32.xlu0 %v35_v3 }
  0x1a   :  { %p136_p12 = pnand %p135_p11, %p129_p8 }
  0xa2   :  { %v34_v4 = vpop.xlane.xlu0 %33 }
  0xa3   :  { %v39_v5 = vmul.f32 0.03125, %v34_v4 }
  0xa5   :  { %v41_v6 = vsub.f32 %v29_v0, %v39_v5 }
  0xa6   :  { %v37_v7 = vpop.xlane.xlu0 %36 }
  0xa7   :  { %v40_v8 = vmul.f32 0.03125, %v37_v7  ;;  %v43_v9 = vmul.f32 %v41_v6, %v41_v6 }
  0xa9   :  { %v42_v10 = vsub.f32 %v30_v1, %v40_v8  ;;  %v45_v11 = vsel %vm31_vm0, %v43_v9, 0.0 }
  0xaa   :  { %46 = vadd.xlane.f32.xlu1 %v45_v11 }
  0xab   :  { %v44_v12 = vmul.f32 %v42_v10, %v42_v10 }
  0xad   :  { %v48_v13 = vsel %vm31_vm0, %v44_v12, 0.0 }
  0xae   :  { %49 = vadd.xlane.f32.xlu1 %v48_v13 }
 0x137   :  { %v47_v14 = vpop.xlane.xlu1 %46 }
 0x138   :  { %v51_v15 = vmul.f32 0.03125, %v47_v14 }
 0x13a   :  { %v55_v16 = vadd.f32 1e-05, %v51_v15 }
 0x13b   :  { %v50_v17 = vpop.xlane.xlu1 %49 }
 0x13c   :  { %102 = vrsqrt.f32 %v55_v16  ;;  %v52_v18 = vmul.f32 0.03125, %v50_v17 }
 0x13e   :  { %v56_v19 = vadd.f32 1e-05, %v52_v18 }
 0x140   :  { %104 = vrsqrt.f32 %v56_v19 }
 0x146   :  { %v103_v20 = vpop.eup %102 }
 0x147   :  { %v59_v22 = vmul.f32 %v103_v20, %v41_v6 }
 0x149   :  { %v67_v24 = vmul.f32 %v96_v21, %v59_v22 }
 0x14a   :  { %v105_v25 = vpop.eup %104 }
 0x14b   :  { %v60_v26 = vmul.f32 %v105_v25, %v42_v10  ;;  %v75_v27 = vadd.f32 %v97_v23, %v67_v24 }
 0x14d   :  { %v68_v28 = vmul.f32 %v96_v21, %v60_v26  ;;  %77 = vst.msk [vmem:[#allocation5] sm:$0xff] %vm31_vm0, %v75_v27 }
 0x14f   :  { %v76_v29 = vadd.f32 %v97_v23, %v68_v28 }
 0x151   :  { %78 = vst.msk [vmem:[#allocation5 + $0x8] sm:$0xff] %vm31_vm0, %v76_v29 }
 0x152   :  { %139 = shalt.err (!%p136_p12)
}
 0x153   :  { %s140_s5 = scalar_lea.hbm %s223_s3, 256 }
 0x154   :  { %p141_p13 = scmp.ne.s32.totalorder %s223_s3, %s140_s5  ;;  %p144_p0 = scmp.lt.u32.totalorder %s140_s5, %s223_s3 }
 0x156   :  { %p146_p1 = pnand %p144_p0, %p141_p13 }
 0x158   :  { %149 = shalt.err (!%p146_p1)
}
 0x159   :  { %90 = dma.vmem_to_hbm [thread:$0]  %s85_s30, 256, %s223_s3, [#allocation4], %s155_s22, %s155_s22, %s156_s23  }
 0x15a   :  { %152 = dma.done.wait [#allocation4], 256  }
 0x15b   :  { %153 = vsyncadd [#allocation4], 4294967040 }
 0x15c   :  { %94 = vsyncpa [#allocation3], 1 }
 0x15d   :  { %95 = vsyncpa [#allocation4], 1 }

</bundles_post_ra>
